<compile_context>
chip_gen: v5e
topology: v5e:2x2
jax: 0.10.0
libtpu: 0.0.40
codegen_flags: <defaults>
</compile_context>

<pallas_src>
import jax
import jax.numpy as jnp
from jax.experimental import pallas as pl
from jax.experimental.pallas import tpu as pltpu

LANE = 128     # vreg lane width (last dim)
SUBLANE = 8    # f32 sublane width (second-to-last dim)


def _round_up(x, m):
    return ((x + m - 1) // m) * m


def _round_down(x, m):
    return max((x // m) * m, 0)


def _pad_axis(a, axis, multiple):
    """Zero-pad `a` along `axis` up to the next multiple of `multiple`."""
    pad = (-a.shape[axis]) % multiple
    if pad == 0:
        return a
    widths = [(0, 0)] * a.ndim
    widths[axis] = (0, pad)
    return jnp.pad(a, widths)


def _vmem_capacity_bytes():
    try:
        cap = getattr(pltpu.get_tpu_info(), "vmem_capacity_bytes", None)
        if cap:
            return int(cap)
    except Exception:
        pass
    return 64 * 1024 * 1024  # conservative default: v7x per-TensorCore VMEM


def _pick_divisor_tile(total, desired, quantum=LANE):
    """Largest multiple of `quantum` that divides `total` and is <= desired."""
    m = total // quantum
    best = 1
    for d in range(1, m + 1):
        if m % d == 0 and d * quantum <= desired:
            best = d
    return best * quantum


# ----------------------------------------------------------------------------
# Parameter preparation (done ONCE, outside the hot path).
# ----------------------------------------------------------------------------
def prepare_fc_params(w1, b1, w2, b2, *, use_bf16=False):
    """Pad (and optionally bf16-cast) the FC parameters once.

    w1: (F_in, H), b1: (H,), w2: (H, F_out), b2: (F_out,) -- transposes of
    torch.nn.Linear.weight.  Padding is exact: padded hidden units see a zero
    bias (relu(0)=0) and multiply zero rows of w2; padded output columns are
    sliced off in fc_forward.  Biases stay f32 even in bf16 mode.
    """
    F_in, H = w1.shape
    F_out = w2.shape[1]
    wdtype = jnp.bfloat16 if use_bf16 else w1.dtype
    w1p = _pad_axis(w1, 1, LANE).astype(wdtype)                        # (F_in, H_p)
    w2p = _pad_axis(_pad_axis(w2, 0, LANE), 1, LANE).astype(wdtype)    # (H_p, F_out_p)
    b1p = _pad_axis(b1.reshape(1, H).astype(jnp.float32), 1, LANE)     # (1, H_p)
    b2p = _pad_axis(b2.reshape(1, F_out).astype(jnp.float32), 1, LANE) # (1, F_out_p)
    return dict(w1=w1p, b1=b1p, w2=w2p, b2=b2p, F_in=F_in, H=H, F_out=F_out)


# ----------------------------------------------------------------------------
# Kernels
# ----------------------------------------------------------------------------
def fc_kernel(x_ref, w1_ref, b1_ref, w2_ref, b2_ref, o_ref):
    # h = relu(x @ W1 + b1); both dots accumulate in f32 on the MXU.
    x = x_ref[...].astype(w1_ref.dtype)
    h = jnp.dot(x, w1_ref[...], preferred_element_type=jnp.float32)
    h = jnp.maximum(h + b1_ref[...], 0.0)          # b1 is (1, H_p) -> broadcast
    y = jnp.dot(h.astype(w2_ref.dtype), w2_ref[...],
                preferred_element_type=jnp.float32)
    o_ref[...] = (y + b2_ref[...]).astype(o_ref.dtype)


def fc_hchunk_kernel(x_ref, w1_ref, b1_ref, w2_ref, b2_ref, o_ref, acc_ref):
    # Grid = (batch_tiles, hidden_chunks); the hidden axis is the reduction.
    @pl.when(pl.program_id(1) == 0)
    def _():
        acc_ref[...] = jnp.zeros_like(acc_ref)

    x = x_ref[...].astype(w1_ref.dtype)
    h = jnp.dot(x, w1_ref[...], preferred_element_type=jnp.float32)
    h = jnp.maximum(h + b1_ref[...], 0.0)
    acc_ref[...] += jnp.dot(h.astype(w2_ref.dtype), w2_ref[...],
                            preferred_element_type=jnp.float32)

    @pl.when(pl.program_id(1) == pl.num_programs(1) - 1)
    def _():
        o_ref[...] = (acc_ref[...] + b2_ref[...]).astype(o_ref.dtype)


# ----------------------------------------------------------------------------
# Forward wrapper
# ----------------------------------------------------------------------------
def fc_forward(x, params, *, batch_tile=512, hidden_tile=None):
    """y = relu(x @ w1 + b1) @ w2 + b2 with pre-prepared (padded) params."""
    w1p, b1p, w2p, b2p = params["w1"], params["b1"], params["w2"], params["b2"]
    F_in, H, F_out = params["F_in"], params["H"], params["F_out"]
    B = x.shape[0]
    assert x.shape[1] == F_in, "x feature dim must match prepared params"
    H_p = w1p.shape[1]
    F_out_p = w2p.shape[1]
    out_dtype = x.dtype

    xsz = x.dtype.itemsize
    wsz = w1p.dtype.itemsize
    osz = x.dtype.itemsize

    cap = _vmem_capacity_bytes()
    budget = int(0.7 * cap)                        # leave compiler headroom

    def vmem_limit(needed):
        # Never request more than 85% of physical VMEM (v7x = 64 MiB/TC);
        # never less than a 32 MiB floor (>= v5e's 16 MiB scoped default).
        return int(min(0.85 * cap, max(2 * needed, 32 * 1024 * 1024)))

    cost = pl.CostEstimate(
        flops=2 * B * (F_in * H_p + H_p * F_out_p),
        transcendentals=0,
        bytes_accessed=int(B * F_in * xsz
                           + (F_in * H_p + H_p * F_out_p) * wsz
                           + (H_p + F_out_p) * 4
                           + B * F_out_p * osz),
    )

    weight_bytes = (F_in * H_p + H_p * F_out_p) * wsz + (H_p + F_out_p) * 4

    # ---- Path A: tiny problem -> gridless, everything one VMEM block. ------
    single_needed = (B * F_in * xsz + weight_bytes + B * F_out_p * osz
                     + B * H_p * 4 + B * F_out_p * 4)
    if hidden_tile is None and B <= 256 and single_needed <= int(0.4 * cap):
        out_p = pl.pallas_call(
            fc_kernel,
            out_shape=jax.ShapeDtypeStruct((B, F_out_p), out_dtype),
            in_specs=[pl.BlockSpec(memory_space=pltpu.MemorySpace.VMEM)] * 5,
            out_specs=pl.BlockSpec(memory_space=pltpu.MemorySpace.VMEM),
            compiler_params=pltpu.CompilerParams(
                vmem_limit_bytes=vmem_limit(single_needed)),
            cost_estimate=cost,
        )(x, w1p, b1p, w2p, b2p)
        return out_p[:, :F_out] if F_out_p != F_out else out_p

    # Per-row VMEM cost of a batch tile: double-buffered x/out streams plus
    # the f32 intermediates (h and y) produced inside the kernel.
    row_b = 2 * (F_in * xsz + F_out_p * osz) + H_p * 4 + F_out_p * 4
    avail_b = budget - 2 * weight_bytes            # worst case: 2x weights

    if hidden_tile is None and avail_b >= SUBLANE * row_b:
        # ---- Path B: tile only the batch axis; weights stay VMEM-resident. -
        tm_cap = _round_down(avail_b // row_b, SUBLANE)
        # Cap at ceil(B/2) so the grid has >= 2 "parallel" steps (v7x 2 TCs).
        tm = max(SUBLANE, min(batch_tile, tm_cap,
                              _round_up(pl.cdiv(B, 2), SUBLANE)))
        grid = (pl.cdiv(B, tm),)
        needed = 2 * weight_bytes + tm * row_b

        def run(single_buffer_weights):
            def resident(shape):
                if single_buffer_weights:
                    # Constant index -> no need for two copies in VMEM.
                    return pl.BlockSpec(shape, lambda i: (0, 0),
                                        pipeline_mode=pl.Buffered(1))
                return pl.BlockSpec(shape, lambda i: (0, 0))
            return pl.pallas_call(
                fc_kernel,
                out_shape=jax.ShapeDtypeStruct((B, F_out_p), out_dtype),
                grid=grid,
                in_specs=[
                    pl.BlockSpec((tm, F_in), lambda i: (i, 0)),
                    resident((F_in, H_p)),
                    resident((1, H_p)),
                    resident((H_p, F_out_p)),
                    resident((1, F_out_p)),
                ],
                out_specs=pl.BlockSpec((tm, F_out_p), lambda i: (i, 0)),
                compiler_params=pltpu.CompilerParams(
                    dimension_semantics=("parallel",),
                    vmem_limit_bytes=vmem_limit(needed)),
                cost_estimate=cost,
            )(x, w1p, b1p, w2p, b2p)

        try:
            out_p = run(True)     # single-buffered resident weights
        except Exception:
            out_p = run(False)    # fall back to default double-buffering
        return out_p[:, :F_out] if F_out_p != F_out else out_p

    # ---- Path C: large hidden size -> chunk H with an f32 accumulator. -----
    th = _pick_divisor_tile(H_p, hidden_tile if hidden_tile else 512)
    chunk_bytes = 2 * ((F_in * th + th * F_out_p) * wsz + th * 4) + F_out_p * 4
    row_c = 2 * (F_in * xsz + F_out_p * osz) + th * 4 + 2 * F_out_p * 4
    avail_c = budget - chunk_bytes
    tm_cap = _round_down(max(avail_c, SUBLANE * row_c) // row_c, SUBLANE)
    tm = max(SUBLANE, min(batch_tile, tm_cap,
                          _round_up(pl.cdiv(B, 2), SUBLANE)))
    grid = (pl.cdiv(B, tm), H_p // th)
    needed = chunk_bytes + tm * row_c

    out_p = pl.pallas_call(
        fc_hchunk_kernel,
        out_shape=jax.ShapeDtypeStruct((B, F_out_p), out_dtype),
        grid=grid,
        in_specs=[
            pl.BlockSpec((tm, F_in), lambda i, h: (i, 0)),
            pl.BlockSpec((F_in, th), lambda i, h: (0, h)),
            pl.BlockSpec((1, th), lambda i, h: (0, h)),
            pl.BlockSpec((th, F_out_p), lambda i, h: (h, 0)),
            pl.BlockSpec((1, F_out_p), lambda i, h: (0, 0)),
        ],
        out_specs=pl.BlockSpec((tm, F_out_p), lambda i, h: (i, 0)),
        scratch_shapes=[pltpu.VMEM((tm, F_out_p), jnp.float32)],
        compiler_params=pltpu.CompilerParams(
            dimension_semantics=("parallel", "arbitrary"),
            vmem_limit_bytes=vmem_limit(needed)),
        cost_estimate=cost,
    )(x, w1p, b1p, w2p, b2p)
    return out_p[:, :F_out] if F_out_p != F_out else out_p


def fc_reference(x, w1, b1, w2, b2):
    h = jnp.maximum(x @ w1 + b1, 0.0)
    return h @ w2 + b2


if __name__ == "__main__":
    # Small shapes implied by FC(input_features, hidden_units, output_features).
    batch = 8
    input_features = 32
    hidden_units = 64
    output_features = 16

    key = jax.random.PRNGKey(0)
    kx, kw1, kb1, kw2, kb2, kx2 = jax.random.split(key, 6)

    x = jax.random.normal(kx, (batch, input_features), dtype=jnp.float32)
    # PyTorch-style uniform Linear init (deterministic).
    lim1 = 1.0 / (input_features ** 0.5)
    lim2 = 1.0 / (hidden_units ** 0.5)
    w1 = jax.random.uniform(kw1, (input_features, hidden_units),
                            minval=-lim1, maxval=lim1, dtype=jnp.float32)
    b1 = jax.random.uniform(kb1, (hidden_units,),
                            minval=-lim1, maxval=lim1, dtype=jnp.float32)
    w2 = jax.random.uniform(kw2, (hidden_units, output_features),
                            minval=-lim2, maxval=lim2, dtype=jnp.float32)
    b2 = jax.random.uniform(kb2, (output_features,),
                            minval=-lim2, maxval=lim2, dtype=jnp.float32)

    # Parameters are padded once, outside the hot path.
    params_f32 = prepare_fc_params(w1, b1, w2, b2)

    # 1) Tiny batch -> gridless single-VMEM-block path.
    out = jax.block_until_ready(fc_forward(x, params_f32))
    ref = fc_reference(x, w1, b1, w2, b2)
    assert out.shape == (batch, output_features)
    assert jnp.allclose(out, ref, atol=1e-5, rtol=1e-5), "single-block mismatch"

    # 2) Larger batch -> batch-tiled path (>=2 "parallel" grid steps,
    #    resident single-buffered weights).
    big = 512
    xb = jax.random.normal(kx2, (big, input_features), dtype=jnp.float32)
    out_b = jax.block_until_ready(fc_forward(xb, params_f32))
    ref_b = fc_reference(xb, w1, b1, w2, b2)
    assert out_b.shape == (big, output_features)
    assert jnp.allclose(out_b, ref_b, atol=1e-5, rtol=1e-5), "batch-tiled mismatch"

    # 3) bf16-operand / f32-accumulate path (v6e/v7x MXU rate), looser tol.
    params_bf16 = prepare_fc_params(w1, b1, w2, b2, use_bf16=True)
    out_bf = jax.block_until_ready(fc_forward(xb, params_bf16))
    assert out_bf.shape == (big, output_features)
    assert jnp.allclose(out_bf, ref_b, atol=5e-2, rtol=5e-2), "bf16 mismatch"

    # 4) H-chunked accumulator path (forced via hidden_tile) for larger hidden.
    Bc, Fc_in, Hc, Fc_out = 256, 128, 512, 128
    kxc, kw1c, kb1c, kw2c, kb2c = jax.random.split(jax.random.PRNGKey(1), 5)
    xc = jax.random.normal(kxc, (Bc, Fc_in), dtype=jnp.float32)
    l1 = 1.0 / (Fc_in ** 0.5)
    l2 = 1.0 / (Hc ** 0.5)
    w1c = jax.random.uniform(kw1c, (Fc_in, Hc), minval=-l1, maxval=l1,
                             dtype=jnp.float32)
    b1c = jax.random.uniform(kb1c, (Hc,), minval=-l1, maxval=l1,
                             dtype=jnp.float32)
    w2c = jax.random.uniform(kw2c, (Hc, Fc_out), minval=-l2, maxval=l2,
                             dtype=jnp.float32)
    b2c = jax.random.uniform(kb2c, (Fc_out,), minval=-l2, maxval=l2,
                             dtype=jnp.float32)
    params_c = prepare_fc_params(w1c, b1c, w2c, b2c)
    out_c = jax.block_until_ready(fc_forward(xc, params_c, hidden_tile=256))
    ref_c = fc_reference(xc, w1c, b1c, w2c, b2c)
    assert out_c.shape == (Bc, Fc_out)
    assert jnp.allclose(out_c, ref_c, atol=1e-4, rtol=1e-4), "H-chunked mismatch"

    print("KERNEL_OK")
</pallas_src>

<mosaic_0001>
module attributes {stable_mosaic.version = 11 : i64} {
  func.func @fc_kernel(%arg0: memref<8x32xf32, #tpu.memory_space<vmem>>, %arg1: memref<32x128xf32, #tpu.memory_space<vmem>>, %arg2: memref<1x128xf32, #tpu.memory_space<vmem>>, %arg3: memref<128x128xf32, #tpu.memory_space<vmem>>, %arg4: memref<1x128xf32, #tpu.memory_space<vmem>>, %arg5: memref<8x128xf32, #tpu.memory_space<vmem>>) attributes {dimension_semantics = [], scalar_prefetch = 0 : i64, scratch_operands = 0 : i64, tpu.core_type = #tpu.core_type<tc>} {
    %c0 = arith.constant 0 : index
    %c0_0 = arith.constant 0 : index
    %0 = vector.load %arg0[%c0, %c0_0] : memref<8x32xf32, #tpu.memory_space<vmem>>, vector<8x32xf32>
    %c0_1 = arith.constant 0 : index
    %c0_2 = arith.constant 0 : index
    %1 = vector.load %arg1[%c0_1, %c0_2] : memref<32x128xf32, #tpu.memory_space<vmem>>, vector<32x128xf32>
    %cst = arith.constant dense<0.000000e+00> : vector<8x128xf32>
    %2 = tpu.matmul %0, %1, %cst {dimension_numbers = #tpu.dot_dimension_numbers<[1], [0], [0], [1], [0, 0, 1, 1], [], []>} : vector<8x32xf32>, vector<32x128xf32>, vector<8x128xf32> -> vector<8x128xf32>
    %c0_3 = arith.constant 0 : index
    %c0_4 = arith.constant 0 : index
    %3 = vector.load %arg2[%c0_3, %c0_4] : memref<1x128xf32, #tpu.memory_space<vmem>>, vector<1x128xf32>
    %4 = vector.broadcast %3 : vector<1x128xf32> to vector<8x128xf32>
    %5 = arith.addf %2, %4 : vector<8x128xf32>
    %cst_5 = arith.constant 0.000000e+00 : f32
    %6 = vector.broadcast %cst_5 : f32 to vector<8x128xf32>
    %7 = arith.maximumf %5, %6 : vector<8x128xf32>
    %c0_6 = arith.constant 0 : index
    %c0_7 = arith.constant 0 : index
    %8 = vector.load %arg3[%c0_6, %c0_7] : memref<128x128xf32, #tpu.memory_space<vmem>>, vector<128x128xf32>
    %cst_8 = arith.constant dense<0.000000e+00> : vector<8x128xf32>
    %9 = tpu.matmul %7, %8, %cst_8 {dimension_numbers = #tpu.dot_dimension_numbers<[1], [0], [0], [1], [0, 0, 1, 1], [], []>} : vector<8x128xf32>, vector<128x128xf32>, vector<8x128xf32> -> vector<8x128xf32>
    %c0_9 = arith.constant 0 : index
    %c0_10 = arith.constant 0 : index
    %10 = vector.load %arg4[%c0_9, %c0_10] : memref<1x128xf32, #tpu.memory_space<vmem>>, vector<1x128xf32>
    %11 = vector.broadcast %10 : vector<1x128xf32> to vector<8x128xf32>
    %12 = arith.addf %9, %11 : vector<8x128xf32>
    %c0_11 = arith.constant 0 : index
    %c0_12 = arith.constant 0 : index
    %13 = vector.load %arg5[%c0_11, %c0_12] : memref<8x128xf32, #tpu.memory_space<vmem>>, vector<8x128xf32>
    tpu.vector_store %arg5[%c0_11, %c0_12], %12 {strides = array<i32>} : memref<8x128xf32, #tpu.memory_space<vmem>>, vector<8x128xf32>,
    return
  }
}

</mosaic_0001>

<bundles_post_ra>
// kernel: tpu_custom_call.1
= control target key start
LH: loop header
LB: loop body
LE: loop exit
PB: predicated region body
PF: predicated region fallthrough
CT: control target
= control target key end

     0   :  { %10 = vsyncpa [#allocation3], 0  ;;  %s324_s0 = inlined_call_operand.hbm [shape: f32[8,32], index: 0, kind: input, shape index: {}]   ;;  %s325_s1 = inlined_call_operand.hbm [shape: f32[32,128], index: 1, kind: input, shape index: {}]   ;;  %s326_s2 = inlined_call_operand.vmem [shape: f32[1,128], index: 2, kind: input, shape index: {}]   ;;  %s327_s3 = inlined_call_operand.hbm [shape: f32[128,128], index: 3, kind: input, shape index: {}]   ;;  %s328_s4 = inlined_call_operand.vmem [shape: f32[1,128], index: 4, kind: input, shape index: {}]   ;;  %s329_s5 = inlined_call_operand.hbm [shape: f32[8,128], index: 5, kind: output, shape index: {}]  }
   0x1   :  { %11 = vsyncpa [#allocation6], 0  ;;  %s28_s20 = sshll.u32 %s325_s1, 4  ;;  %s29_s20 = int_to_ptr.hbm [resolvable:$true] %s28_s20 }
   0x2   :  { %12 = vsyncpa [#allocation4], 0  ;;  %s270_s21 = smov [#allocation5]   ;;  %s18_s25 = sshll.u32 %s324_s0, 4  ;;  %s19_s25 = int_to_ptr.hbm [resolvable:$true] %s18_s25 }
   0x3   :  { %s30_s22 = sshll.u32 %s270_s21, 4  ;;  %s271_s26 = smov 128   ;;  %s31_s22 = int_to_ptr.vmem [resolvable:$true] %s30_s22 }
   0x4   :  { %s272_s27 = smov 8   ;;  %s273_s28 = smov [#allocation2]  }
   0x5   :  { %36 = dma.hbm_to_vmem [thread:$0]  %s29_s20, 512, %s31_s22, [#allocation6], %s271_s26, %s271_s26, %s272_s27  }
   0x6   :  { %s20_s29 = sshll.u32 %s273_s28, 4  ;;  %s43_s7 = sshll.u32 %s327_s3, 4  ;;  %s21_s29 = int_to_ptr.vmem [resolvable:$true] %s20_s29  ;;  %s44_s7 = int_to_ptr.hbm [resolvable:$true] %s43_s7 }
   0x7   :  { %23 = dma.hbm_to_vmem [thread:$0]  %s19_s25, 128, %s21_s29, [#allocation3]  }
   0x8   :  { %s274_s1 = smov [#allocation7]  }
   0x9   :  { %s45_s8 = sshll.u32 %s274_s1, 4  ;;  %s46_s8 = int_to_ptr.vmem [resolvable:$true] %s45_s8 }
   0xa   :  { %51 = dma.hbm_to_vmem [thread:$0]  %s44_s7, 2048, %s46_s8, [#allocation6], %s271_s26, %s271_s26, %s272_s27  }
   0xb   :  { %264 = dma.done.wait [#allocation3], 128  }
   0xc   :  { %265 = vsyncadd [#allocation3], 4294967168 }
   0xd   :  { %266 = dma.done.wait [#allocation6], 2560  }
   0xe   :  { %267 = vsyncadd [#allocation6], 4294964736  ;;  %v70_v0 = vld [vmem:[#allocation5 + $0x18] sm:$0xff]  ;;  %v69_v1 = vld [vmem:[#allocation5 + $0x10] sm:$0xff]  ;;  %vm75_vm0 = vcmask 261120   ;;  %s275_s11 = smov [#allocation8]  }
   0xf   :  { %91 = vmatpush.msra.mxu0 %v70_v0  ;;  %v115_v2 = vld [vmem:[#allocation7 + $0x78] sm:$0xff]  ;;  %v68_v3 = vld [vmem:[#allocation5 + $0x8] sm:$0xff]  ;;  %v114_v4 = vld [vmem:[#allocation7 + $0x70] sm:$0xff]  ;;  %s146_s12 = sshll.u32 %s275_s11, 4  ;;  %s148_s15 = sshll.u32 %s329_s5, 4  ;;  %s147_s12 = int_to_ptr.vmem [resolvable:$true] %s146_s12  ;;  %s149_s15 = int_to_ptr.hbm [resolvable:$true] %s148_s15 }
  0x10   :  { %120 = vmatpush.msra.mxu1 %v115_v2  ;;  %v113_v5 = vld [vmem:[#allocation7 + $0x68] sm:$0xff]  ;;  %v67_v6 = vld [vmem:[#allocation5] sm:$0xff]  ;;  %v66_v7 = vld [vmem:[#allocation2] sm:$0xff] }
  0x11   :  { %92 = vmatpush.msra.mxu0 %v69_v1  ;;  %v112_v8 = vld [vmem:[#allocation7 + $0x60] sm:$0xff]  ;;  %v111_v9 = vld [vmem:[#allocation7 + $0x58] sm:$0xff]  ;;  %v110_v10 = vld [vmem:[#allocation7 + $0x50] sm:$0xff] }
  0x12   :  { %121 = vmatpush.msra.mxu1 %v114_v4  ;;  %v109_v11 = vld [vmem:[#allocation7 + $0x48] sm:$0xff]  ;;  %v108_v12 = vld [vmem:[#allocation7 + $0x40] sm:$0xff]  ;;  %v107_v13 = vld [vmem:[#allocation7 + $0x38] sm:$0xff] }
  0x13   :  { %93 = vmatpush.msra.mxu0 %v68_v3  ;;  %v106_v14 = vld [vmem:[#allocation7 + $0x30] sm:$0xff]  ;;  %v105_v15 = vld [vmem:[#allocation7 + $0x28] sm:$0xff]  ;;  %v104_v16 = vld [vmem:[#allocation7 + $0x20] sm:$0xff] }
  0x14   :  { %122 = vmatpush.msra.mxu1 %v113_v5  ;;  %v103_v17 = vld [vmem:[#allocation7 + $0x18] sm:$0xff]  ;;  %v102_v18 = vld [vmem:[#allocation7 + $0x10] sm:$0xff]  ;;  %v101_v19 = vld [vmem:[#allocation7 + $0x8] sm:$0xff] }
  0x15   :  { %94 = vmatpush.msra.mxu0 %v67_v6  ;;  %v100_v20 = vld [vmem:[#allocation7] sm:$0xff]  ;;  %v166_v21 = vld [vmem:[%s326_s2] ss:$0 sm:$0xff] }
  0x16   :  { %159 = vmatmul.msk.f32.vlgmr.msra.gmra.mxu0 %vm75_vm0, %v66_v7  ;;  %123 = vmatpush.msra.mxu1 %v112_v8  ;;  %v167_v25 = vld [vmem:[%s328_s4] ss:$0 sm:$0xff] }
  0x18   :  { %124 = vmatpush.msra.mxu1 %v111_v9 }
  0x1a   :  { %125 = vmatpush.msra.mxu1 %v110_v10 }
  0x1c   :  { %126 = vmatpush.msra.mxu1 %v109_v11 }
  0x1e   :  { %127 = vmatpush.msra.mxu1 %v108_v12 }
  0x20   :  { %128 = vmatpush.msra.mxu1 %v107_v13 }
  0x22   :  { %129 = vmatpush.msra.mxu1 %v106_v14 }
  0x24   :  { %130 = vmatpush.msra.mxu1 %v105_v15 }
  0x26   :  { %131 = vmatpush.msra.mxu1 %v104_v16 }
  0x28   :  { %132 = vmatpush.msra.mxu1 %v103_v17 }
  0x2a   :  { %133 = vmatpush.msra.mxu1 %v102_v18 }
  0x2c   :  { %134 = vmatpush.msra.mxu1 %v101_v19 }
  0x2e   :  { %135 = vmatpush.msra.mxu1 %v100_v20 }
  0x93   :  { %v96_v22 = vpop.f32.mrf.mxu0 }
  0x94   :  { %v97_v23 = vadd.f32 %v166_v21, %v96_v22 }
  0x96   :  { %v99_v24 = vmax.f32 %v97_v23, 0.0 }
  0x98   :  { %136 = vmatmul.f32.vlgmr.msra.gmra.mxu1 %v99_v24 }
 0x115   :  { %v137_v26 = vpop.f32.mrf.mxu1 }
 0x116   :  { %v138_v27 = vadd.f32 %v167_v25, %v137_v26 }
 0x118   :  { %140 = vst [vmem:[#allocation8] sm:$0xff] %v138_v27 }
 0x119   :  { %151 = dma.vmem_to_hbm [thread:$0]  %s147_s12, 128, %s149_s15, [#allocation4]  }
 0x11a   :  { %268 = dma.done.wait [#allocation4], 128  }
 0x11b   :  { %269 = vsyncadd [#allocation4], 4294967168 }
 0x11c   :  { %156 = vsyncpa [#allocation3], 1 }
 0x11d   :  { %157 = vsyncpa [#allocation6], 1 }
 0x11e   :  { %158 = vsyncpa [#allocation4], 1 }

</bundles_post_ra>
